<compile_context>
chip_gen: v5e
topology: v5e:2x2
jax: 0.10.0
libtpu: 0.0.40
codegen_flags: <defaults>
</compile_context>

<pallas_src>
import functools

import jax
import jax.numpy as jnp
from jax.experimental import pallas as pl
from jax.experimental.pallas import tpu as pltpu

PREFIX = "mmocr_text_detection"
BBOX = "bbox"
IMAGE = "image"

# MXU operand dtype.  jnp.bfloat16 is a further ~3x matmul / ~2x bandwidth win on
# v6e/v7x; kept f32 for exact parity with the f32 reference check (50x DB gain).
MATMUL_DTYPE = jnp.float32


def _query_vmem_limit_bytes():
    """Per-generation VMEM budget for the kernel (v5e/v6e: 128 MiB phys, v7x: 64 MiB)."""
    try:
        cap = pltpu.get_tpu_info().vmem_capacity_bytes
    except Exception:
        cap = 64 * 1024 * 1024          # v7x-safe fallback
    return int(min(0.75 * cap, 96 * 1024 * 1024))


_VMEM_LIMIT = _query_vmem_limit_bytes()


# ----------------------------------------------------------------------------
# Fused kernel:  3x3 'same' conv (+bias, ReLU)  ->  1x1 head  ->  sigmoids
#                ->  DB binarization, with pixels in the lane dimension.
#
# Refs (C = in channels, F = hidden channels, T = pixel tile, HALO = 128*k >= W+1):
#   lo_ref  (C, HALO)   pixels [i*T - HALO, i*T)      of the flattened image (+pad)
#   mid_ref (C, T)      pixels [i*T, (i+1)*T)
#   hi_ref  (C, HALO)   pixels [(i+1)*T, (i+1)*T + HALO)
#   w1t_ref (F, 9*C)    conv weight, tap-major (dy, dx, c)
#   b1_ref  (F, 1)      conv bias
#   w2t_ref (2, F)      1x1 head weight
#   b2_ref  (2, 1)      head bias
#   out_ref (3, T)      rows: prob map, thresh map, binary map
# ----------------------------------------------------------------------------
def _db_head_kernel(lo_ref, mid_ref, hi_ref,
                    w1t_ref, b1_ref, w2t_ref, b2_ref, out_ref,
                    *, width, halo):
    tile = mid_ref.shape[-1]

    # Haloed pixel strip in VMEM (every piece is a 128-lane-aligned block).
    x = jnp.concatenate([lo_ref[...], mid_ref[...], hi_ref[...]], axis=-1)  # (C, HALO+T+HALO)

    # Column (w) coordinate of every pixel in this tile, rebuilt in-kernel
    # (replaces the per-step col DMA stream of the previous version).
    p0 = pl.program_id(1) * tile
    col = (p0 + jax.lax.broadcasted_iota(jnp.int32, (1, tile), 1)) % width
    not_left = (col != 0).astype(jnp.float32)            # kills wrapped w-1 reads
    not_right = (col != width - 1).astype(jnp.float32)   # kills wrapped w+1 reads

    # Build the (9C, T) im2col slab from static lane-offset slices of the strip,
    # then run the whole 3x3 conv as ONE K=9C MXU matmul (nothing inflated in HBM).
    strips = []
    for t in range(9):
        dy, dx = divmod(t, 3)
        start = halo + (dy - 1) * width + (dx - 1)
        s = x[:, start:start + tile]                      # (C, T)
        if dx == 0:
            s = s * not_left
        elif dx == 2:
            s = s * not_right
        strips.append(s)
    slab = jnp.concatenate(strips, axis=0)                # (9C, T), rows = (dy, dx, c)

    h = jnp.dot(w1t_ref[...].astype(MATMUL_DTYPE), slab.astype(MATMUL_DTYPE),
                preferred_element_type=jnp.float32)        # (F, T)
    h = jnp.maximum(h + b1_ref[...], 0.0)                  # conv bias + ReLU (f32)

    logits = jnp.dot(w2t_ref[...].astype(MATMUL_DTYPE), h.astype(MATMUL_DTYPE),
                     preferred_element_type=jnp.float32) + b2_ref[...]   # (2, T)

    prob = jax.nn.sigmoid(logits[0:1, :])                  # probability map
    thr = jax.nn.sigmoid(logits[1:2, :])                   # threshold map
    binary = jax.nn.sigmoid(50.0 * (prob - thr))           # DB binarization, fused

    # Single lane-dense (3, T) store (was three 1-sublane masked stores).
    out_ref[...] = jnp.concatenate([prob, thr, binary], axis=0)


@jax.jit
def _detector_maps(x_nchw, w1t, b1c, w2t, b2c):
    """Dense DBNet-style forward.  Returns [B, 3, H, W]: prob / thresh / binary maps."""
    x = x_nchw.astype(jnp.float32)
    B, C, H, W = x.shape
    F = w1t.shape[0]
    P = H * W

    # Lane-dense pixel tiling.  The halo covers one image row (+1) so every 3x3 tap
    # is a static in-bounds slice of the haloed strip.
    halo = 128 * pl.cdiv(W + 1, 128)
    assert halo >= W + 1, (halo, W)   # shifted-tap slices must stay inside the strip

    # Tile as large as the per-generation VMEM budget allows (amortizes halo re-reads
    # and the per-step overhead).  Rough per-pixel VMEM bytes: double-buffered
    # input/output blocks + haloed strip + (9C, T) slab + (F, T) hidden + temporaries.
    per_px_bytes = 4 * (3 * C + 9 * C + F + 2 * 3 + 12)
    max_tile = max(halo, (_VMEM_LIMIT // 2) // per_px_bytes)     # 2x compiler headroom
    t_mult = max(1, min(max_tile // halo, pl.cdiv(P, halo)))
    # Keep >= 2 program instances so both v7x TensorCores get work (1-TC chips unaffected).
    if B * pl.cdiv(P, halo * t_mult) < 2 and t_mult > 1:
        t_mult = max(1, pl.cdiv(pl.cdiv(P, halo), 2))
    tile = halo * t_mult
    nblk = pl.cdiv(P, tile)
    p_pad = nblk * tile
    r = tile // halo

    # Native NCHW layout flattened so pixels are the last (lane) dim -> no transposes.
    # One jnp.pad pass supplies (a) zeros for the first block's lo halo / top rows and
    # (b) the tail + hi halo of the last block.  The left pad is a full tile (not just
    # `halo`) so the blocked lo/mid/hi index maps stay tile/halo aligned; the extra
    # zeros are negligible next to the copy jnp.pad makes anyway.
    # TODO(synk): manual-DMA (pl.ANY) boundary handling would remove this copy entirely.
    x_flat = x.reshape(B, C, P)
    xp = jnp.pad(x_flat, ((0, 0), (0, 0), (tile, tile + p_pad - P)))

    kernel = functools.partial(_db_head_kernel, width=W, halo=halo)

    out = pl.pallas_call(
        kernel,
        out_shape=jax.ShapeDtypeStruct((B, 3, p_pad), jnp.float32),
        grid_spec=pltpu.PrefetchScalarGridSpec(
            num_scalar_prefetch=0,
            grid=(B, nblk),
            in_specs=[
                # lo halo / main tile / hi halo of the same padded array: the halo is
                # expressed purely through blocked index maps (no 9x im2col in HBM).
                pl.BlockSpec((None, C, halo), lambda b, i: (b, 0, (i + 1) * r - 1)),
                pl.BlockSpec((None, C, tile), lambda b, i: (b, 0, i + 1)),
                pl.BlockSpec((None, C, halo), lambda b, i: (b, 0, (i + 2) * r)),
                # constant weight / bias blocks (index maps constant across the grid).
                pl.BlockSpec((F, 9 * C), lambda b, i: (0, 0)),
                pl.BlockSpec((F, 1), lambda b, i: (0, 0)),
                pl.BlockSpec((2, F), lambda b, i: (0, 0)),
                pl.BlockSpec((2, 1), lambda b, i: (0, 0)),
            ],
            # Lane-dense output block (3, tile); tile is a multiple of 128.
            out_specs=pl.BlockSpec((None, 3, tile), lambda b, i: (b, 0, i)),
        ),
        compiler_params=pltpu.CompilerParams(
            dimension_semantics=("parallel", "parallel"),   # shards over v7x's 2 TCs
            vmem_limit_bytes=_VMEM_LIMIT,
        ),
    )(xp, xp, xp, w1t, b1c, w2t, b2c)

    return out[:, :, :P].reshape(B, 3, H, W)


def _reference_maps(x_nchw, w_conv, b1, w_head, b2):
    """Pure-JAX reference of the same synthetic detector (for the correctness check)."""
    x = x_nchw.astype(jnp.float32)
    y = jax.lax.conv_general_dilated(
        x, w_conv, window_strides=(1, 1), padding="SAME",
        dimension_numbers=("NCHW", "OIHW", "NCHW"),
        precision=jax.lax.Precision.HIGHEST)
    y = jnp.maximum(y + b1.reshape(1, -1, 1, 1), 0.0)
    z = jnp.einsum("bfhw,of->bohw", y, w_head,
                   precision=jax.lax.Precision.HIGHEST) + b2.reshape(1, -1, 1, 1)
    s = jax.nn.sigmoid(z)
    prob, thr = s[:, 0], s[:, 1]
    binary = jax.nn.sigmoid(50.0 * (prob - thr))
    return prob, thr, binary


class MMOCRAutoModelForTextDetectionPallas:
    """Pallas reimplementation of the dense forward of MMOCRAutoModelForTextDetection."""

    def __init__(self, prefix: str, checkpoint_name: str = "dbnet_synthetic",
                 in_channels: int = 4, hidden_channels: int = 32, seed: int = 0):
        self.prefix = prefix
        self.checkpoint_name = checkpoint_name
        # TODO(synk): the real module loads a pretrained MMOCR checkpoint; here we draw
        # small random weights for the synthetic DBNet-style backbone stage + head.
        key = jax.random.PRNGKey(seed)
        k1, k2, k3, k4 = jax.random.split(key, 4)
        f, c = hidden_channels, in_channels
        # Reference (PyTorch-like) layouts.
        self.w_conv = 0.1 * jax.random.normal(k1, (f, c, 3, 3), dtype=jnp.float32)  # OIHW
        self.b1 = 0.1 * jax.random.normal(k2, (f,), dtype=jnp.float32)
        self.w_head = 0.1 * jax.random.normal(k3, (2, f), dtype=jnp.float32)        # [out, F]
        self.b2 = 0.1 * jax.random.normal(k4, (2,), dtype=jnp.float32)
        # Kernel layouts (pixels live in lanes, so everything is transposed).
        self.w1t = jnp.transpose(self.w_conv, (0, 2, 3, 1)).reshape(f, 9 * c)  # [F, (dy,dx,c)]
        self.b1c = self.b1.reshape(f, 1)
        self.w2t = self.w_head                                                  # [2, F]
        self.b2c = self.b2.reshape(2, 1)

    @property
    def image_key(self):
        return f"{self.prefix}_{IMAGE}"

    def forward(self, batch: dict):
        data = batch[self.image_key]
        imgs = data["img"][0]               # mirrors `data['img'] = [img.data[0] ...]`
        _img_metas = data["img_metas"][0]   # metadata unused by the dense compute

        maps = _detector_maps(imgs, self.w1t, self.b1c, self.w2t, self.b2c)  # [B,3,H,W]
        prob_map, thresh_map, binary_map = maps[:, 0], maps[:, 1], maps[:, 2]

        # TODO(synk): MMOCR's `boundary_result` runs cv2 contour extraction / polygon
        # scoring on CPU; no Pallas/TPU equivalent, so the dense maps are returned.
        ret = {BBOX: {"prob_map": prob_map,
                      "thresh_map": thresh_map,
                      "binary_map": binary_map}}
        return {self.prefix: ret}


if __name__ == "__main__":
    B, C, H, W = 2, 4, 16, 16
    F = 32
    key = jax.random.PRNGKey(0)
    img = jax.random.normal(key, (B, C, H, W), dtype=jnp.float32)  # NCHW, like PyTorch
    img_metas = [{"ori_shape": (H, W, C), "img_shape": (H, W, C), "scale_factor": 1.0}
                 for _ in range(B)]

    model = MMOCRAutoModelForTextDetectionPallas(PREFIX, in_channels=C,
                                                 hidden_channels=F, seed=0)
    batch = {model.image_key: {"img": [img], "img_metas": [img_metas]}}

    out = model.forward(batch)
    res = out[PREFIX][BBOX]
    jax.block_until_ready(res["binary_map"])

    prob, thr, binary = res["prob_map"], res["thresh_map"], res["binary_map"]
    assert prob.shape == (B, H, W), prob.shape
    assert thr.shape == (B, H, W), thr.shape
    assert binary.shape == (B, H, W), binary.shape
    assert bool(jnp.all(jnp.isfinite(prob)))
    assert bool(jnp.all(jnp.isfinite(binary)))

    # Correctness vs a pure-JAX reference of the same synthetic detector.
    p_ref, t_ref, b_ref = _reference_maps(img, model.w_conv, model.b1,
                                          model.w_head, model.b2)
    assert bool(jnp.allclose(prob, p_ref, atol=5e-3, rtol=5e-3)), \
        float(jnp.max(jnp.abs(prob - p_ref)))
    assert bool(jnp.allclose(thr, t_ref, atol=5e-3, rtol=5e-3)), \
        float(jnp.max(jnp.abs(thr - t_ref)))
    assert bool(jnp.allclose(binary, b_ref, atol=2e-2, rtol=2e-2)), \
        float(jnp.max(jnp.abs(binary - b_ref)))

    print("KERNEL_OK")
</pallas_src>

<mosaic_0001>
module attributes {stable_mosaic.version = 11 : i64} {
  func.func @_db_head_kernel(%arg0: i32, %arg1: i32, %arg2: memref<1x4x128xf32, #tpu.memory_space<vmem>>, %arg3: memref<1x4x256xf32, #tpu.memory_space<vmem>>, %arg4: memref<1x4x128xf32, #tpu.memory_space<vmem>>, %arg5: memref<32x36xf32, #tpu.memory_space<vmem>>, %arg6: memref<32x1xf32, #tpu.memory_space<vmem>>, %arg7: memref<2x32xf32, #tpu.memory_space<vmem>>, %arg8: memref<2x1xf32, #tpu.memory_space<vmem>>, %arg9: memref<1x3x256xf32, #tpu.memory_space<vmem>>) attributes {dimension_semantics = [#tpu.dimension_semantics<parallel>, #tpu.dimension_semantics<parallel>], iteration_bounds = array<i64: 2, 1>, scalar_prefetch = 0 : i64, scratch_operands = 0 : i64, tpu.core_type = #tpu.core_type<tc>, window_params = [{transform_indices = @transform_0, window_bounds = array<i64: 1, 4, 128>}, {transform_indices = @transform_1, window_bounds = array<i64: 1, 4, 256>}, {transform_indices = @transform_2, window_bounds = array<i64: 1, 4, 128>}, {pipeline_mode = #tpu.pipeline_mode<synchronous>, transform_indices = @transform_3, window_bounds = array<i64: 32, 36>}, {pipeline_mode = #tpu.pipeline_mode<synchronous>, transform_indices = @transform_4, window_bounds = array<i64: 32, 1>}, {pipeline_mode = #tpu.pipeline_mode<synchronous>, transform_indices = @transform_5, window_bounds = array<i64: 2, 32>}, {pipeline_mode = #tpu.pipeline_mode<synchronous>, transform_indices = @transform_6, window_bounds = array<i64: 2, 1>}, {transform_indices = @transform_7, window_bounds = array<i64: 1, 3, 256>}]} {
    %c0 = arith.constant 0 : index
    %c0_0 = arith.constant 0 : index
    %c0_1 = arith.constant 0 : index
    %0 = vector.load %arg2[%c0, %c0_0, %c0_1] : memref<1x4x128xf32, #tpu.memory_space<vmem>>, vector<1x4x128xf32>
    %1 = vector.shape_cast %0 : vector<1x4x128xf32> to vector<4x128xf32>
    %c0_2 = arith.constant 0 : index
    %c0_3 = arith.constant 0 : index
    %c0_4 = arith.constant 0 : index
    %2 = vector.load %arg3[%c0_2, %c0_3, %c0_4] : memref<1x4x256xf32, #tpu.memory_space<vmem>>, vector<1x4x256xf32>
    %3 = vector.shape_cast %2 : vector<1x4x256xf32> to vector<4x256xf32>
    %c0_5 = arith.constant 0 : index
    %c0_6 = arith.constant 0 : index
    %c0_7 = arith.constant 0 : index
    %4 = vector.load %arg4[%c0_5, %c0_6, %c0_7] : memref<1x4x128xf32, #tpu.memory_space<vmem>>, vector<1x4x128xf32>
    %5 = vector.shape_cast %4 : vector<1x4x128xf32> to vector<4x128xf32>
    %6 = tpu.concatenate %1, %3, %5 in 1 : vector<4x128xf32>, vector<4x256xf32>, vector<4x128xf32> -> vector<4x512xf32>
    %c256_i32 = arith.constant 256 : i32
    %7 = arith.muli %arg1, %c256_i32 : i32
    %8 = tpu.iota {dimensions = array<i32: 1>} : vector<1x256xi32>
    %9 = vector.broadcast %7 : i32 to vector<1x256xi32>
    %10 = arith.addi %9, %8 : vector<1x256xi32>
    %c16_i32 = arith.constant 16 : i32
    %c0_i32 = arith.constant 0 : i32
    %11 = arith.cmpi eq, %c16_i32, %c0_i32 : i32
    %c1_i32 = arith.constant 1 : i32
    %12 = arith.select %11, %c1_i32, %c16_i32 : i32
    %13 = vector.broadcast %12 : i32 to vector<1x256xi32>
    %14 = arith.remsi %10, %13 : vector<1x256xi32>
    %c0_i32_8 = arith.constant 0 : i32
    %15 = vector.broadcast %c0_i32_8 : i32 to vector<1x256xi32>
    %16 = arith.cmpi ne, %14, %15 : vector<1x256xi32>
    %c0_i32_9 = arith.constant 0 : i32
    %17 = vector.broadcast %c0_i32_9 : i32 to vector<1x256xi32>
    %18 = arith.cmpi slt, %14, %17 : vector<1x256xi32>
    %c0_i32_10 = arith.constant 0 : i32
    %19 = arith.cmpi slt, %12, %c0_i32_10 : i32
    %20 = vector.broadcast %19 : i1 to vector<1x256xi1>
    %21 = vector.broadcast %20 : vector<1x256xi1> to vector<1x256xi1>
    %22 = arith.xori %18, %21 : vector<1x256xi1>
    %23 = arith.andi %22, %16 : vector<1x256xi1>
    %24 = vector.broadcast %12 : i32 to vector<1x256xi32>
    %25 = arith.addi %14, %24 : vector<1x256xi32>
    %26 = arith.select %23, %25, %14 : vector<1x256xi1>, vector<1x256xi32>
    %c0_i32_11 = arith.constant 0 : i32
    %27 = vector.broadcast %c0_i32_11 : i32 to vector<1x256xi32>
    %28 = arith.cmpi ne, %26, %27 : vector<1x256xi32>
    %29 = arith.extui %28 : vector<1x256xi1> to vector<1x256xi32>
    %30 = arith.sitofp %29 : vector<1x256xi32> to vector<1x256xf32>
    %c15_i32 = arith.constant 15 : i32
    %31 = vector.broadcast %c15_i32 : i32 to vector<1x256xi32>
    %32 = arith.cmpi ne, %26, %31 : vector<1x256xi32>
    %33 = arith.extui %32 : vector<1x256xi1> to vector<1x256xi32>
    %34 = arith.sitofp %33 : vector<1x256xi32> to vector<1x256xf32>
    %35 = vector.extract_strided_slice %6 {offsets = [0, 111], sizes = [4, 256], strides = [1, 1]} : vector<4x512xf32> to vector<4x256xf32>
    %36 = vector.broadcast %30 : vector<1x256xf32> to vector<4x256xf32>
    %37 = arith.mulf %35, %36 : vector<4x256xf32>
    %38 = vector.extract_strided_slice %6 {offsets = [0, 112], sizes = [4, 256], strides = [1, 1]} : vector<4x512xf32> to vector<4x256xf32>
    %39 = vector.extract_strided_slice %6 {offsets = [0, 113], sizes = [4, 256], strides = [1, 1]} : vector<4x512xf32> to vector<4x256xf32>
    %40 = vector.broadcast %34 : vector<1x256xf32> to vector<4x256xf32>
    %41 = arith.mulf %39, %40 : vector<4x256xf32>
    %42 = vector.extract_strided_slice %6 {offsets = [0, 127], sizes = [4, 256], strides = [1, 1]} : vector<4x512xf32> to vector<4x256xf32>
    %43 = vector.broadcast %30 : vector<1x256xf32> to vector<4x256xf32>
    %44 = arith.mulf %42, %43 : vector<4x256xf32>
    %45 = vector.extract_strided_slice %6 {offsets = [0, 128], sizes = [4, 256], strides = [1, 1]} : vector<4x512xf32> to vector<4x256xf32>
    %46 = vector.extract_strided_slice %6 {offsets = [0, 129], sizes = [4, 256], strides = [1, 1]} : vector<4x512xf32> to vector<4x256xf32>
    %47 = vector.broadcast %34 : vector<1x256xf32> to vector<4x256xf32>
    %48 = arith.mulf %46, %47 : vector<4x256xf32>
    %49 = vector.extract_strided_slice %6 {offsets = [0, 143], sizes = [4, 256], strides = [1, 1]} : vector<4x512xf32> to vector<4x256xf32>
    %50 = vector.broadcast %30 : vector<1x256xf32> to vector<4x256xf32>
    %51 = arith.mulf %49, %50 : vector<4x256xf32>
    %52 = vector.extract_strided_slice %6 {offsets = [0, 144], sizes = [4, 256], strides = [1, 1]} : vector<4x512xf32> to vector<4x256xf32>
    %53 = vector.extract_strided_slice %6 {offsets = [0, 145], sizes = [4, 256], strides = [1, 1]} : vector<4x512xf32> to vector<4x256xf32>
    %54 = vector.broadcast %34 : vector<1x256xf32> to vector<4x256xf32>
    %55 = arith.mulf %53, %54 : vector<4x256xf32>
    %56 = tpu.concatenate %37, %38, %41, %44, %45, %48, %51, %52, %55 in 0 : vector<4x256xf32>, vector<4x256xf32>, vector<4x256xf32>, vector<4x256xf32>, vector<4x256xf32>, vector<4x256xf32>, vector<4x256xf32>, vector<4x256xf32>, vector<4x256xf32> -> vector<36x256xf32>
    %c0_12 = arith.constant 0 : index
    %c0_13 = arith.constant 0 : index
    %57 = vector.load %arg5[%c0_12, %c0_13] : memref<32x36xf32, #tpu.memory_space<vmem>>, vector<32x36xf32>
    %cst = arith.constant dense<0.000000e+00> : vector<32x256xf32>
    %58 = tpu.matmul %57, %56, %cst {dimension_numbers = #tpu.dot_dimension_numbers<[1], [0], [0], [1], [0, 0, 1, 1], [], []>} : vector<32x36xf32>, vector<36x256xf32>, vector<32x256xf32> -> vector<32x256xf32>
    %c0_14 = arith.constant 0 : index
    %c0_15 = arith.constant 0 : index
    %59 = vector.load %arg6[%c0_14, %c0_15] : memref<32x1xf32, #tpu.memory_space<vmem>>, vector<32x1xf32>
    %60 = vector.broadcast %59 : vector<32x1xf32> to vector<32x256xf32>
    %61 = arith.addf %58, %60 : vector<32x256xf32>
    %cst_16 = arith.constant 0.000000e+00 : f32
    %62 = vector.broadcast %cst_16 : f32 to vector<32x256xf32>
    %63 = arith.maximumf %61, %62 : vector<32x256xf32>
    %c0_17 = arith.constant 0 : index
    %c0_18 = arith.constant 0 : index
    %64 = vector.load %arg7[%c0_17, %c0_18] : memref<2x32xf32, #tpu.memory_space<vmem>>, vector<2x32xf32>
    %cst_19 = arith.constant dense<0.000000e+00> : vector<2x256xf32>
    %65 = tpu.matmul %64, %63, %cst_19 {dimension_numbers = #tpu.dot_dimension_numbers<[1], [0], [0], [1], [0, 0, 1, 1], [], []>} : vector<2x32xf32>, vector<32x256xf32>, vector<2x256xf32> -> vector<2x256xf32>
    %c0_20 = arith.constant 0 : index
    %c0_21 = arith.constant 0 : index
    %66 = vector.load %arg8[%c0_20, %c0_21] : memref<2x1xf32, #tpu.memory_space<vmem>>, vector<2x1xf32>
    %67 = vector.broadcast %66 : vector<2x1xf32> to vector<2x256xf32>
    %68 = arith.addf %65, %67 : vector<2x256xf32>
    %69 = vector.extract_strided_slice %68 {offsets = [0, 0], sizes = [1, 256], strides = [1, 1]} : vector<2x256xf32> to vector<1x256xf32>
    %70 = arith.negf %69 : vector<1x256xf32>
    %71 = math.exp %70 : vector<1x256xf32>
    %cst_22 = arith.constant 1.000000e+00 : f32
    %72 = vector.broadcast %cst_22 : f32 to vector<1x256xf32>
    %73 = arith.addf %72, %71 : vector<1x256xf32>
    %74 = arith.divf %72, %73 : vector<1x256xf32>
    %75 = vector.extract_strided_slice %68 {offsets = [1, 0], sizes = [1, 256], strides = [1, 1]} : vector<2x256xf32> to vector<1x256xf32>
    %76 = arith.negf %75 : vector<1x256xf32>
    %77 = math.exp %76 : vector<1x256xf32>
    %cst_23 = arith.constant 1.000000e+00 : f32
    %78 = vector.broadcast %cst_23 : f32 to vector<1x256xf32>
    %79 = arith.addf %78, %77 : vector<1x256xf32>
    %80 = arith.divf %78, %79 : vector<1x256xf32>
    %81 = arith.subf %74, %80 : vector<1x256xf32>
    %cst_24 = arith.constant 5.000000e+01 : f32
    %82 = vector.broadcast %cst_24 : f32 to vector<1x256xf32>
    %83 = arith.mulf %82, %81 : vector<1x256xf32>
    %84 = arith.negf %83 : vector<1x256xf32>
    %85 = math.exp %84 : vector<1x256xf32>
    %cst_25 = arith.constant 1.000000e+00 : f32
    %86 = vector.broadcast %cst_25 : f32 to vector<1x256xf32>
    %87 = arith.addf %86, %85 : vector<1x256xf32>
    %88 = arith.divf %86, %87 : vector<1x256xf32>
    %89 = tpu.concatenate %74, %80, %88 in 0 : vector<1x256xf32>, vector<1x256xf32>, vector<1x256xf32> -> vector<3x256xf32>
    %c0_26 = arith.constant 0 : index
    %c0_27 = arith.constant 0 : index
    %c0_28 = arith.constant 0 : index
    %90 = vector.load %arg9[%c0_26, %c0_27, %c0_28] : memref<1x3x256xf32, #tpu.memory_space<vmem>>, vector<1x3x256xf32>
    %91 = vector.shape_cast %90 : vector<1x3x256xf32> to vector<3x256xf32>
    %92 = vector.shape_cast %89 : vector<3x256xf32> to vector<1x3x256xf32>
    tpu.vector_store %arg9[%c0_26, %c0_27, %c0_28], %92 {strides = array<i32>} : memref<1x3x256xf32, #tpu.memory_space<vmem>>, vector<1x3x256xf32>,
    return
  }
  func.func @transform_0(%arg0: i32, %arg1: i32) -> (i32, i32, i32) {
    %c1_i32 = arith.constant 1 : i32
    %0 = arith.addi %arg1, %c1_i32 : i32
    %c2_i32 = arith.constant 2 : i32
    %1 = arith.muli %0, %c2_i32 : i32
    %c1_i32_0 = arith.constant 1 : i32
    %2 = arith.subi %1, %c1_i32_0 : i32
    %c0_i32 = arith.constant 0 : i32
    %c0_i32_1 = arith.constant 0 : i32
    return %arg0, %c0_i32, %2 : i32, i32, i32
  }
  func.func @transform_1(%arg0: i32, %arg1: i32) -> (i32, i32, i32) {
    %c1_i32 = arith.constant 1 : i32
    %0 = arith.addi %arg1, %c1_i32 : i32
    %c0_i32 = arith.constant 0 : i32
    %c0_i32_0 = arith.constant 0 : i32
    return %arg0, %c0_i32, %0 : i32, i32, i32
  }
  func.func @transform_2(%arg0: i32, %arg1: i32) -> (i32, i32, i32) {
    %c2_i32 = arith.constant 2 : i32
    %0 = arith.addi %arg1, %c2_i32 : i32
    %c2_i32_0 = arith.constant 2 : i32
    %1 = arith.muli %0, %c2_i32_0 : i32
    %c0_i32 = arith.constant 0 : i32
    %c0_i32_1 = arith.constant 0 : i32
    return %arg0, %c0_i32, %1 : i32, i32, i32
  }
  func.func @transform_3(%arg0: i32, %arg1: i32) -> (i32, i32) {
    %c0_i32 = arith.constant 0 : i32
    %c0_i32_0 = arith.constant 0 : i32
    %c0_i32_1 = arith.constant 0 : i32
    return %c0_i32, %c0_i32_0 : i32, i32
  }
  func.func @transform_4(%arg0: i32, %arg1: i32) -> (i32, i32) {
    %c0_i32 = arith.constant 0 : i32
    %c0_i32_0 = arith.constant 0 : i32
    %c0_i32_1 = arith.constant 0 : i32
    return %c0_i32, %c0_i32_0 : i32, i32
  }
  func.func @transform_5(%arg0: i32, %arg1: i32) -> (i32, i32) {
    %c0_i32 = arith.constant 0 : i32
    %c0_i32_0 = arith.constant 0 : i32
    %c0_i32_1 = arith.constant 0 : i32
    return %c0_i32, %c0_i32_0 : i32, i32
  }
  func.func @transform_6(%arg0: i32, %arg1: i32) -> (i32, i32) {
    %c0_i32 = arith.constant 0 : i32
    %c0_i32_0 = arith.constant 0 : i32
    %c0_i32_1 = arith.constant 0 : i32
    return %c0_i32, %c0_i32_0 : i32, i32
  }
  func.func @transform_7(%arg0: i32, %arg1: i32) -> (i32, i32, i32) {
    %c0_i32 = arith.constant 0 : i32
    %c0_i32_0 = arith.constant 0 : i32
    return %arg0, %c0_i32, %arg1 : i32, i32, i32
  }
}

</mosaic_0001>

<bundles_post_ra>
// kernel: _detector_maps.1
= control target key start
LH: loop header
LB: loop body
LE: loop exit
PB: predicated region body
PF: predicated region fallthrough
CT: control target
= control target key end

     0   :  { %s1405_s24 = smov 0   ;;  %s1407_s25 = smov 0   ;;  %s1589_s0 = inlined_call_operand.vmem [shape: f32[2,4,768], index: 0, kind: input, shape index: {}, may-alias: {0,1,2}]   ;;  %s1590_s1 = inlined_call_operand.vmem [shape: f32[2,4,768], index: 1, kind: input, shape index: {}, may-alias: {0,1,2}]   ;;  %s1591_s2 = inlined_call_operand.vmem [shape: f32[2,4,768], index: 2, kind: input, shape index: {}, may-alias: {0,1,2}]   ;;  %s1592_s3 = inlined_call_operand.vmem [shape: f32[32,36], index: 3, kind: input, shape index: {}]   ;;  %s1593_s4 = inlined_call_operand.vmem [shape: f32[32,1], index: 4, kind: input, shape index: {}]   ;;  %s1594_s5 = inlined_call_operand.vmem [shape: f32[2,32], index: 5, kind: input, shape index: {}]   ;;  %s1595_s6 = inlined_call_operand.vmem [shape: f32[2,1], index: 6, kind: input, shape index: {}]   ;;  %s1596_s7 = inlined_call_operand.vmem [shape: f32[2,3,256], index: 7, kind: output, shape index: {}]  }
   0x1   :  { %s1409_s26 = smov 0  }
   0x2 LB: > { %s29_s27 = sadd.s32 1, %s1345_s25  ;;  %p1128_p0 = scmp.ge.s32.totalorder %s1349_s26, 1  ;;  %s1349_s26 = sphi %s1409_s26, %s17_s26   ;;  %s1345_s25 = sphi %s1407_s25, %s1598_s25   ;;  %s1341_s24 = sphi %s1405_s24, %s1597_s24  }
   0x3   : > { %p31_p1 = scmp.ge.s32.totalorder %s29_s27, 2  ;;  %p312_p2 = scmp.lt.s32.totalorder %s1349_s26, 3 }
   0x5   : > { %s1600_s27 = smov (%p31_p1, %s29_s27), 0  ;;  %p313_p3 = pnand %p1128_p0, %p312_p2 }
   0x6   : > { %p377_p4 = scmp.lt.s32.totalorder (!%p313_p3), %s1341_s24, 1  ;;  %s1352_s14 = smov (!%p313_p3), 17  }
   0x7   : > { %316 = sbr.rel (%p313_p3) target bundleno = 760 (0x2f8), region = 48  ;;  %s1353_s15 = smov (!%p313_p3), 15  }
   0x8   : > { %s1354_s16 = smov (!%p313_p3), 113   ;;  %s1355_s17 = smov (!%p313_p3), 1  }
   0x9   : > { %s1356_s18 = smov (!%p313_p3), 127   ;;  %s1357_s19 = smov (!%p313_p3), 95  }
   0xa   : > { %s1358_s20 = smov (!%p313_p3), 111   ;;  %s1359_s21 = smov (!%p313_p3), 94  }
   0xb   : > { %s1360_s22 = smov (!%p313_p3), 96   ;;  %s1361_s23 = smov (!%p313_p3), 126  }
   0xc   : > { %v432_v0 = vlaneseq  ;;  %s1602_s24 = smov (!%p377_p4, %s1341_s24), 1  ;;  %v1351_v5 = vmov 0.0   ;;  %vm494_vm4 = vcmask 924672   ;;  %vm530_vm5 = vcmask 121856  }
   0xd   : > { %s1426_s28 = smul.u32 24, %s1602_s24  ;;  %vm542_vm6 = vcmask 138240   ;;  %vm518_vm7 = vcmask 7168   ;;  %vm506_vm8 = vcmask 1039360   ;;  %vm633_vm9 = vcmask 785408   ;;  %s1162_s12 = sshll.u32 %s1602_s24, 3 }
   0xe   : > { %v433_v1 = vand.u32 127, %v432_v0  ;;  %vm647_vm10 = vcmask 777216   ;;  %vm665_vm11 = vcmask 1043456   ;;  %vm592_vm12 = vcmask 916480  }
   0xf   : > { %s1159_s29 = sadd.s32 8, %s1426_s28  ;;  %s1161_s30 = sadd.s32 16, %s1426_s28  ;;  %vm662_vm13 = vcmask 769024   ;;  %vm574_vm14 = vcmask 1031168   ;;  %vm480_vm15 = vcmask 908288  }
  0x10   : > { %v434_v2 = vadd.s32 128, %v433_v1  ;;  %v442_v3 = vand.u32 15, %v433_v1  ;;  %s397_s10 = scalar_lea.vmem %s1590_s1, %s1159_s29  ;;  %s409_s13 = scalar_lea.vmem %s1591_s2, %s1161_s30 }
  0x11   : > { %v423_v12 = vld [vmem:[%s397_s10] sm:$0xff]  ;;  %s1157_s29 = sadd.s32 4, %s1426_s28  ;;  %s1362_s10 = smov 110  }
  0x12   : > { %v449_v4 = vand.u32 15, %v434_v2  ;;  %vm468_vm0 = vcmp.ne.s32.totalorder %v442_v3, 15  ;;  %vm462_vm1 = vcmp.ne.s32.totalorder %v442_v3, 0  ;;  %426 = vst [vmem:[#allocation1] ss:$2 sm:$0xff] %v423_v12  ;;  %s384_s9 = scalar_lea.vmem %s1589_s0, %s1157_s29  ;;  %s1363_s28 = smov 112  }
  0x13   : > { %v1136_v6 = vsel %vm468_vm0, 1.0, %v1351_v5  ;;  %v1134_v7 = vsel %vm462_vm1, 1.0, %v1351_v5  ;;  %v1437_v13 = vld [vmem:[%s409_s13] sm:$0xf]  ;;  %vm618_vm0 = vcmask 900096   ;;  %vm766_vm1 = vcmask 293888  }
  0x14   : > { %vm469_vm2 = vcmp.ne.s32.totalorder %v449_v4, 15  ;;  %vm463_vm3 = vcmp.ne.s32.totalorder %v449_v4, 0  ;;  %v640_v14 = vrot.slane %v1437_v13, 4  ;;  %v1477_v62 = vld [vmem:[%s384_s9] sm:$0xf] }
  0x15   : > { %v1137_v8 = vsel %vm469_vm2, 1.0, %v1351_v5  ;;  %v1135_v9 = vsel %vm463_vm3, 1.0, %v1351_v5  ;;  %v551_v0 = vrot.slane %v1477_v62, 4  ;;  %vm856_vm2 = vcmask 261120  }
  0x16   : > { %v1213_v10 = vpack.i.bf16 %v1137_v8, %v1136_v6  ;;  %v1223_v11 = vpack.i.bf16 %v1135_v9, %v1134_v7 }
  0x18   : > { %1214 = vrot.lane.b32.xlu0 %v1213_v10, %s1352_s14  ;;  %1224 = vrot.lane.b32.xlu1 %v1223_v11, %s1353_s15  ;;  %s420_s15 = scalar_lea.vmem %s1596_s7, %s1162_s12 }
  0x19   : > { %1234 = vrot.lane.b32.xlu2 %v1213_v10, %s1354_s16  ;;  %v1440_v15 = vld.sshfl [vmem:[#allocation1] sm:$0xff pattern:$0x75316420]  ;;  %v1442_v16 = vld.sshfl [vmem:[#allocation1 + $0x8] sm:$0xff pattern:$0x75316420] }
  0x1a   : > { %v552_v17 = vrot.slane %v1440_v15, 4  ;;  %v553_v18 = vrot.slane %v1442_v16, 4  ;;  %v1238_v20 = vpack.i.bf16 %v1442_v16, %v1440_v15 }
  0x1c   : > { %v1447_v19 = vpack.i.bf16 %v553_v18, %v552_v17 }
  0x20   : > { %1219 = vrot.lane.b32.xlu0 %v1213_v10, %s1355_s17  ;;  %1229 = vrot.lane.b32.xlu1 %v1223_v11, %s1356_s18 }
  0x21   : > { %645 = vrot.lane.b32.xlu2 %v640_v14, %s1357_s19 }
  0x28   : > { %1249 = vrot.lane.b32.xlu1 %v1447_v19, %s1357_s19  ;;  %1239 = vrot.lane.b32.xlu0 %v1238_v20, %s1358_s20 }
  0x30   : > { %1244 = vrot.lane.b32.xlu0 %v1223_v11, %s1358_s20 }
  0x73   : > { %v1452_v21 = vpop.permute.xlu2 %1234 }
  0x74   : > { %v1237_v22 = vunpack.i.h.bf16 %v1452_v21  ;;  %v1236_v23 = vunpack.i.l.bf16 %v1452_v21 }
  0x76   : > { %v495_v30 = vsel %vm494_vm4, %v1236_v23, %v1237_v22  ;;  %v501_v35 = vmul.f32 %v1237_v22, %v1442_v16  ;;  %v499_v1 = vmul.f32 %v1236_v23, %v1477_v62 }
  0x77   : > { %v500_v36 = vmul.f32 %v495_v30, %v1440_v15 }
  0x79   : > { %v1263_v44 = vpack.i.bf16 %v501_v35, %v500_v36 }
  0x7b   : > { %v646_v4 = vpop.permute.xlu2 %645 }
  0x8a   : > { %v1215_v24 = vpop.permute.xlu0 %1214  ;;  %v1225_v25 = vpop.permute.xlu1 %1224 }
  0x8b   : > { %v1217_v26 = vunpack.i.h.bf16 %v1215_v24  ;;  %v1216_v27 = vunpack.i.l.bf16 %v1215_v24  ;;  %v1227_v28 = vunpack.i.h.bf16 %v1225_v25  ;;  %v1226_v29 = vunpack.i.l.bf16 %v1225_v25 }
  0x8d   : > { %v547_v31 = vmul.f32 %v1216_v27, %v1440_v15  ;;  %v549_v32 = vmul.f32 %v1217_v26, %v1437_v13  ;;  %v531_v33 = vsel %vm530_vm5, %v1226_v29, %v1227_v28  ;;  %v537_v34 = vmul.f32 %v1227_v28, %v1437_v13 }
  0x8e   : > { %v535_v37 = vmul.f32 %v1226_v29, %v1440_v15  ;;  %v536_v38 = vmul.f32 %v531_v33, %v1442_v16  ;;  %v543_v43 = vsel %vm542_vm6, %v1216_v27, %v1217_v26 }
  0x8f   : > { %660 = vrot.lane.b32.xlu1 %v549_v32, %s1359_s21  ;;  %656 = vrot.lane.b32.xlu2 %v547_v31, %s1359_s21  ;;  %v548_v50 = vmul.f32 %v543_v43, %v1442_v16 }
  0x90   : > { %631 = vrot.lane.b32.xlu0 %v537_v34, %s1360_s22  ;;  %v1258_v49 = vpack.i.bf16 %v536_v38, %v535_v37 }
  0x92   : > { %v1220_v39 = vpop.permute.xlu0 %1219  ;;  %v1230_v40 = vpop.permute.xlu1 %1229 }
  0x93   : > { %v1222_v41 = vunpack.i.h.bf16 %v1220_v39  ;;  %v1221_v42 = vunpack.i.l.bf16 %v1220_v39  ;;  %v1232_v45 = vunpack.i.h.bf16 %v1230_v40  ;;  %v1231_v46 = vunpack.i.l.bf16 %v1230_v40 }
  0x95   : > { %v519_v47 = vsel %vm518_vm7, %v1221_v42, %v1222_v41  ;;  %v523_v48 = vmul.f32 %v1221_v42, %v1440_v15  ;;  %v507_v54 = vsel %vm506_vm8, %v1231_v46, %v1232_v45  ;;  %v525_v55 = vmul.f32 %v1222_v41, %v1437_v13 }
  0x96   : > { %v524_v51 = vmul.f32 %v519_v47, %v1442_v16  ;;  %v513_v57 = vmul.f32 %v1232_v45, %v1442_v16  ;;  %v512_v58 = vmul.f32 %v507_v54, %v1440_v15  ;;  %v511_v2 = vmul.f32 %v1231_v46, %v1477_v62 }
  0x97   : > { %v609_v52 = vrot.slane %v523_v48, 4  ;;  %1259 = vrot.lane.b32.xlu2 %v1258_v49, %s1360_s22  ;;  %1264 = vrot.lane.b32.xlu1 %v1263_v44, %s1361_s23  ;;  %v611_v59 = vrot.slane %v525_v55, 4 }
  0x98   : > { %658 = vrot.lane.b32.xlu0 %v548_v50, %s1359_s21  ;;  %v610_v53 = vrot.slane %v524_v51, 4  ;;  %v585_v60 = vrot.slane %v513_v57, 4  ;;  %v584_v61 = vrot.slane %v512_v58, 4  ;;  %v583_v3 = vrot.slane %v511_v2, 4 }
  0x9a   : > { %v1268_v56 = vpack.i.bf16 %v610_v53, %v609_v52  ;;  %v1273_v63 = vpack.i.bf16 %v585_v60, %v584_v61  ;;  %v1484_v6 = vpop.permute.xlu0 %1239  ;;  %v1250_v9 = vpop.permute.xlu1 %1249 }
  0x9b   : > { %v1251_v10 = vunpack.i.l.bf16 %v1250_v9  ;;  %v1252_v14 = vunpack.i.h.bf16 %v1250_v9  ;;  %v1242_v40 = vunpack.i.h.bf16 %v1484_v6  ;;  %v1241_v41 = vunpack.i.l.bf16 %v1484_v6 }
  0x9d   : > { %v648_v17 = vsel %vm647_vm10, %v1251_v10, %v1252_v14  ;;  %v649_v22 = vsel %vm647_vm10, %v1252_v14, %v646_v4  ;;  %v602_v48 = vsel %vm480_vm15, %v1241_v41, %v1242_v40 }
  0x9f   : > { %616 = vrot.lane.b32.xlu2 %v611_v59, %s1362_s10  ;;  %1269 = vrot.lane.b32.xlu1 %v1268_v56, %s1362_s10 }
  0xa0   : > { %1254 = vrot.lane.b32.xlu0 %v1447_v19, %s1356_s18 }
  0xa2   : > { %v1486_v8 = vpop.permute.xlu0 %1244 }
  0xa3   : > { %v1247_v43 = vunpack.i.h.bf16 %v1486_v8  ;;  %v1246_v44 = vunpack.i.l.bf16 %v1486_v8 }
  0xa5   : > { %v481_v58 = vsel %vm480_vm15, %v1246_v44, %v1247_v43  ;;  %v485_v2 = vmul.f32 %v1246_v44, %v1477_v62 }
  0xa7   : > { %568 = vrot.lane.b32.xlu1 %v499_v1, %s1361_s23  ;;  %1274 = vrot.lane.b32.xlu2 %v1273_v63, %s1363_s28  ;;  %v487_v63 = vmul.f32 %v1247_v43, %v1442_v16  ;;  %v681_v43 = vld [vmem:[%s1592_s3 + $0x18] sm:$0xff] }
  0xa8   : > { %554 = vrot.lane.b32.xlu0 %v551_v0, %s1356_s18  ;;  %v486_v0 = vmul.f32 %v481_v58, %v1440_v15 }
  0xaf   : > { %586 = vrot.lane.b32.xlu2 %v583_v3, %s1363_s28 }
  0xe9   : > { %v657_v5 = vpop.permute.xlu2 %656 }
  0xea   : > { %742 = vrot.lane.b32.xlu1 %v657_v5, %s1352_s14 }
  0xf1   : > { %v1260_v7 = vpop.permute.xlu2 %1259 }
  0xf2   : > { %v1262_v11 = vunpack.i.h.bf16 %v1260_v7  ;;  %v1261_v12 = vunpack.i.l.bf16 %v1260_v7 }
  0xf4   : > { %v634_v18 = vsel %vm633_vm9, %v1261_v12, %v1262_v11  ;;  %v675_v38 = vsel %vm665_vm11, %v1261_v12, %v1251_v10  ;;  %v1364_v12 = vmov 0  }
  0xf5   : > { %v676_v24 = vsel %vm665_vm11, %v634_v18, %v648_v17  ;;  %1308 = vset.pattern.permute.xlu1 %v1364_v12  ;;  %1310 = vset.pattern.permute.xlu0 %v1364_v12 }
  0xf6   : > { %1309 = vset.pattern.permute.xlu2 %v1364_v12 }
  0xf9   : > { %v617_v13 = vpop.permute.xlu2 %616 }
 0x101   : > { %v661_v19 = vpop.permute.xlu1 %660  ;;  %v1275_v25 = vpop.permute.xlu2 %1274 }
 0x102   : > { %v632_v20 = vpop.permute.xlu0 %631  ;;  %v1277_v27 = vunpack.i.h.bf16 %v1275_v25  ;;  %v1276_v28 = vunpack.i.l.bf16 %v1275_v25  ;;  %v682_v25 = vld [vmem:[%s1593_s4] sm:$0xff] }
 0x103   : > { %v635_v21 = vsel %vm633_vm9, %v1262_v11, %v632_v20 }
 0x104   : > { %v677_v23 = vsel %vm665_vm11, %v635_v21, %v649_v22  ;;  %v594_v33 = vsel %vm592_vm12, %v1276_v28, %v1277_v27 }
 0x105   : > { %v1278_v26 = vpack.i.bf16 %v677_v23, %v676_v24 }
 0x107   : > { %1279 = vrot.lane.b32.xlu0 %v1278_v26, %s1352_s14 }
 0x109   : > { %v1265_v29 = vpop.permute.xlu1 %1264  ;;  %v587_v60 = vpop.permute.xlu2 %586 }
 0x10a   : > { %v659_v30 = vpop.permute.xlu0 %658  ;;  %v1267_v31 = vunpack.i.h.bf16 %v1265_v29  ;;  %v1266_v32 = vunpack.i.l.bf16 %v1265_v29  ;;  %v593_v3 = vsel %vm592_vm12, %v587_v60, %v1276_v28 }
 0x10b   : > { %v664_v34 = vsel %vm662_vm13, %v659_v30, %v661_v19  ;;  %v663_v35 = vsel %vm662_vm13, %v657_v5, %v659_v30 }
 0x10c   : > { %v576_v36 = vsel %vm574_vm14, %v1266_v32, %v1267_v31  ;;  %746 = vrot.lane.b32.xlu2 %v664_v34, %s1352_s14  ;;  %744 = vrot.lane.b32.xlu1 %v663_v35, %s1352_s14  ;;  %v671_v50 = vsel %vm665_vm11, %v1267_v31, %v1277_v27 }
 0x10d   : > { %v670_v37 = vsel %vm665_vm11, %v576_v36, %v594_v33  ;;  %v684_v33 = vld [vmem:[%s1593_s4 + $0x10] sm:$0xff] }
 0x10e   : > { %v1298_v39 = vpack.i.bf16 %v670_v37, %v675_v38 }
 0x110   : > { %1299 = vrot.lane.b32.xlu0 %v1298_v39, %s1352_s14 }
 0x111   : > { %v1270_v42 = vpop.permute.xlu1 %1269 }
 0x112   : > { %v1255_v45 = vpop.permute.xlu0 %1254  ;;  %v1272_v46 = vunpack.i.h.bf16 %v1270_v42  ;;  %v1271_v47 = vunpack.i.l.bf16 %v1270_v42  ;;  %v678_v42 = vld [vmem:[%s1592_s3] sm:$0xff] }
 0x113   : > { %v1257_v49 = vunpack.i.h.bf16 %v1255_v45  ;;  %v1256_v51 = vunpack.i.l.bf16 %v1255_v45  ;;  %v850_v45 = vld [vmem:[%s1595_s6] sm:$0x3] }
 0x114   : > { %v620_v52 = vsel %vm618_vm0, %v1272_v46, %v617_v13  ;;  %v619_v53 = vsel %vm618_vm0, %v1271_v47, %v1272_v46  ;;  %v672_v54 = vsel %vm665_vm11, %v1241_v41, %v1271_v47  ;;  %v685_v13 = vld [vmem:[%s1593_s4 + $0x18] sm:$0xff] }
 0x115   : > { %v1283_v55 = vpack.i.bf16 %v672_v54, %v671_v50  ;;  %v673_v56 = vsel %vm665_vm11, %v602_v48, %v619_v53  ;;  %v674_v57 = vsel %vm665_vm11, %v1242_v40, %v620_v52  ;;  %v561_v61 = vsel %vm506_vm8, %v1256_v51, %v1257_v49  ;;  %v680_v52 = vld [vmem:[%s1592_s3 + $0x10] sm:$0xff] }
 0x116   : > { %v1288_v59 = vpack.i.bf16 %v674_v57, %v673_v56  ;;  %v667_v8 = vsel %vm665_vm11, %v486_v0, %v561_v61  ;;  %v668_v9 = vsel %vm665_vm11, %v487_v63, %v1257_v49 }
 0x117   : > { %1284 = vrot.lane.b32.xlu1 %v1283_v55, %s1352_s14  ;;  %v1293_v15 = vpack.i.bf16 %v668_v9, %v667_v8 }
 0x118   : > { %1289 = vrot.lane.b32.xlu2 %v1288_v59, %s1352_s14 }
 0x119   : > { %v569_v1 = vpop.permute.xlu1 %568 }
 0x11a   : > { %v555_v4 = vpop.permute.xlu0 %554  ;;  %v575_v5 = vsel %vm574_vm14, %v569_v1, %v1266_v32  ;;  %v683_v32 = vld [vmem:[%s1593_s4 + $0x8] sm:$0xff] }
 0x11b   : > { %v560_v6 = vsel %vm506_vm8, %v555_v4, %v1256_v51  ;;  %v669_v7 = vsel %vm665_vm11, %v575_v5, %v593_v3  ;;  %v679_v51 = vld [vmem:[%s1592_s3 + $0x8] sm:$0xff] }
 0x11c   : > { %v666_v16 = vsel %vm665_vm11, %v485_v2, %v560_v6 }
 0x11d   : > { %v1303_v10 = vpack.i.bf16 %v666_v16, %v669_v7 }
 0x11f   : > { %1304 = vrot.lane.b32.xlu0 %v1303_v10, %s1352_s14  ;;  %703 = vperm.xlu1 %1308, %v685_v13  }
 0x120   : > { %1294 = vrot.lane.b32.xlu2 %v1293_v15, %s1352_s14  ;;  %v849_v15 = vld [vmem:[%s1594_s5] sm:$0x3] }
 0x127   : > { %688 = vperm.xlu1 %1308, %v682_v25   ;;  %693 = vperm.xlu0 %1310, %v683_v32  }
 0x128   : > { %698 = vperm.xlu2 %1309, %v684_v33  }
 0x130   : > { %853 = vperm.xlu2 %1309, %v850_v45  }
 0x15c   : > { %v743_v11 = vpop.permute.xlu1 %742 }
 0x166   : > { %v747_v62 = vpop.permute.xlu2 %746 }
 0x172   : > { %v1290_v17 = vpop.permute.xlu2 %1289 }
 0x173   : > { %v1292_v23 = vunpack.i.h.bf16 %v1290_v17  ;;  %v1291_v24 = vunpack.i.l.bf16 %v1290_v17 }
 0x175   : > { %v753_v29 = vsel %vm542_vm6, %v1291_v24, %v1292_v23 }
 0x179   : > { %v1280_v14 = vpop.permute.xlu0 %1279 }
 0x17a   : > { %v1282_v18 = vunpack.i.h.bf16 %v1280_v14  ;;  %v1281_v19 = vunpack.i.l.bf16 %v1280_v14  ;;  %v1295_v31 = vpop.permute.xlu2 %1294 }
 0x17b   : > { %v1297_v38 = vunpack.i.h.bf16 %v1295_v31  ;;  %v1296_v39 = vunpack.i.l.bf16 %v1295_v31 }
 0x17c   : > { %v755_v26 = vsel %vm542_vm6, %v1281_v19, %v1282_v18 }
 0x17d   : > { %v749_v44 = vsel %vm542_vm6, %v1296_v39, %v1297_v38 }
 0x17e   : > { %v745_v20 = vpop.permute.xlu1 %744 }
 0x17f   : > { %v756_v21 = vsel %vm542_vm6, %v743_v11, %v745_v20  ;;  %v757_v22 = vsel %vm542_vm6, %v745_v20, %v747_v62 }
 0x180   : > { %1138 = vmatpush.msk.msra.mxu0 %vm665_vm11, %v756_v21  ;;  %1163 = vmatpush.msk.msra.mxu2 %vm665_vm11, %v756_v21 }
 0x181   : > { %1143 = vmatpush.msk.msra.mxu1 %vm665_vm11, %v757_v22  ;;  %1168 = vmatpush.msk.msra.mxu3 %vm665_vm11, %v757_v22 }
 0x182   : > { %v1300_v27 = vpop.permute.xlu0 %1299  ;;  %v699_v2 = vpop.permute.xlu2 %698 }
 0x183   : > { %824 = vmatpush.msra.mxu1 %v755_v26  ;;  %1169 = vmatpush.msra.mxu3 %v755_v26  ;;  %v1301_v28 = vunpack.i.l.bf16 %v1300_v27  ;;  %v1302_v35 = vunpack.i.h.bf16 %v1300_v27 }
 0x185   : > { %825 = vmatpush.msra.mxu1 %v753_v29  ;;  %1170 = vmatpush.msra.mxu3 %v753_v29  ;;  %v754_v30 = vsel %vm542_vm6, %v1301_v28, %v1281_v19 }
 0x186   : > { %795 = vmatpush.msra.mxu0 %v754_v30  ;;  %1164 = vmatpush.msra.mxu2 %v754_v30 }
 0x189   : > { %v1285_v34 = vpop.permute.xlu1 %1284 }
 0x18a   : > { %v1287_v36 = vunpack.i.h.bf16 %v1285_v34  ;;  %v1286_v37 = vunpack.i.l.bf16 %v1285_v34  ;;  %v854_v18 = vpop.permute.xlu2 %853 }
 0x18c   : > { %v752_v40 = vsel %vm542_vm6, %v1287_v36, %v1291_v24  ;;  %v751_v41 = vsel %vm542_vm6, %v1302_v35, %v1286_v37 }
 0x18d   : > { %796 = vmatpush.msra.mxu0 %v752_v40  ;;  %1165 = vmatpush.msra.mxu2 %v752_v40 }
 0x18e   : > { %826 = vmatpush.msra.mxu1 %v751_v41  ;;  %1171 = vmatpush.msra.mxu3 %v751_v41 }
 0x190   : > { %827 = vmatpush.msra.mxu1 %v749_v44  ;;  %1172 = vmatpush.msra.mxu3 %v749_v44 }
 0x191   : > { %1144 = vmatmul.msk.f32.vlgmr.msra.gmra.mxu1 %vm766_vm1, %v678_v42  ;;  %v1305_v46 = vpop.permute.xlu0 %1304  ;;  %1147 = vmatmul.msk.f32.vlgmr.msra.gmra.mxu3 %vm766_vm1, %v681_v43  ;;  %v704_v54 = vpop.permute.xlu1 %703 }
 0x192   : > { %v1307_v47 = vunpack.i.h.bf16 %v1305_v46  ;;  %v1306_v48 = vunpack.i.l.bf16 %v1305_v46 }
 0x194   : > { %v750_v49 = vsel %vm542_vm6, %v1306_v48, %v1302_v35  ;;  %v748_v50 = vsel %vm542_vm6, %v1307_v47, %v1296_v39 }
 0x195   : > { %797 = vmatpush.msra.mxu0 %v750_v49  ;;  %1166 = vmatpush.msra.mxu2 %v750_v49 }
 0x197   : > { %798 = vmatpush.msra.mxu0 %v748_v50  ;;  %1167 = vmatpush.msra.mxu2 %v748_v50 }
 0x198   : > { %1139 = vmatmul.msk.f32.vlgmr.msra.gmra.mxu0 %vm766_vm1, %v678_v42  ;;  %1142 = vmatmul.msk.f32.vlgmr.msra.gmra.mxu2 %vm766_vm1, %v681_v43 }
 0x199   : > { %1145 = vmatmul.msk.f32.gmra.mxu1 %vm766_vm1, %v679_v51  ;;  %v694_v61 = vpop.permute.xlu0 %693  ;;  %v689_v0 = vpop.permute.xlu1 %688 }
 0x1a0   : > { %1140 = vmatmul.msk.f32.gmra.mxu0 %vm766_vm1, %v679_v51 }
 0x1a1   : > { %1146 = vmatmul.msk.f32.gmra.mxu1 %vm766_vm1, %v680_v52 }
 0x1a8   : > { %1141 = vmatmul.msk.f32.gmra.mxu0 %vm766_vm1, %v680_v52  ;;  %vm992_vm1 = vcmask 1041408  }
 0x20e   : > { %v829_v53 = vpop.f32.mrf.mxu1 }
 0x20f   : > { %v830_v7 = vadd.f32 %v829_v53, %v689_v0 }
 0x211   : > { %v842_v16 = vmax.f32 %v830_v7, 0.0 }
 0x214   : > { %v838_v55 = vpop.f32.mrf.mxu3 }
 0x215   : > { %v800_v56 = vpop.f32.mrf.mxu0  ;;  %v839_v57 = vadd.f32 %v838_v55, %v704_v54 }
 0x216   : > { %v832_v58 = vpop.f32.mrf.mxu1  ;;  %v801_v12 = vadd.f32 %v800_v56, %v689_v0 }
 0x217   : > { %v848_v59 = vmax.f32 %v839_v57, 0.0  ;;  %v833_v5 = vadd.f32 %v832_v58, %v694_v61 }
 0x218   : > { %v841_v17 = vmax.f32 %v801_v12, 0.0 }
 0x219   : > { %892 = vmatpush.msrb.mxu3 %v848_v59  ;;  %v844_v9 = vmax.f32 %v833_v5, 0.0 }
 0x21b   : > { %v809_v60 = vpop.f32.mrf.mxu2 }
 0x21c   : > { %v810_v63 = vadd.f32 %v809_v60, %v704_v54 }
 0x21d   : > { %v803_v1 = vpop.f32.mrf.mxu0 }
 0x21e   : > { %v835_v3 = vpop.f32.mrf.mxu1  ;;  %v847_v4 = vmax.f32 %v810_v63, 0.0  ;;  %v804_v62 = vadd.f32 %v803_v1, %v694_v61 }
 0x21f   : > { %v836_v6 = vadd.f32 %v835_v3, %v699_v2 }
 0x220   : > { %872 = vmatpush.msrb.mxu2 %v847_v4  ;;  %v843_v14 = vmax.f32 %v804_v62, 0.0 }
 0x221   : > { %v846_v8 = vmax.f32 %v836_v6, 0.0 }
 0x223   : > { %893 = vmatpush.msrb.mxu3 %v846_v8 }
 0x225   : > { %v806_v10 = vpop.f32.mrf.mxu0  ;;  %894 = vmatpush.msrb.mxu3 %v844_v9 }
 0x226   : > { %v807_v11 = vadd.f32 %v806_v10, %v699_v2 }
 0x227   : > { %895 = vmatpush.msrb.mxu3 %v842_v16 }
 0x228   : > { %v845_v13 = vmax.f32 %v807_v11, 0.0  ;;  %1149 = vmatmul.msk.f32.vlgmr.msrb.gmra.mxu3 %vm856_vm2, %v849_v15 }
 0x22a   : > { %873 = vmatpush.msrb.mxu2 %v845_v13 }
 0x22c   : > { %874 = vmatpush.msrb.mxu2 %v843_v14 }
 0x22e   : > { %875 = vmatpush.msrb.mxu2 %v841_v17 }
 0x22f   : > { %1148 = vmatmul.msk.f32.vlgmr.msrb.gmra.mxu2 %vm856_vm2, %v849_v15 }
 0x2ab   : > { %v897_v19 = vpop.f32.mrf.mxu3 }
 0x2ac   : > { %v898_v20 = vadd.f32 %v897_v19, %v854_v18 }
 0x2ae   : > { %v1151_v21 = vmul.f32 -1.442695, %v898_v20 }
 0x2b0   : > { %1311 = vpow2.f32 %v1151_v21 }
 0x2b2   : > { %v877_v22 = vpop.f32.mrf.mxu2 }
 0x2b3   : > { %v878_v23 = vadd.f32 %v877_v22, %v854_v18 }
 0x2b5   : > { %v1150_v24 = vmul.f32 -1.442695, %v878_v23 }
 0x2b6   : > { %v1312_v25 = vpop.eup %1311 }
 0x2b7   : > { %v907_v26 = vadd.f32 1.0, %v1312_v25  ;;  %1313 = vpow2.f32 %v1150_v24 }
 0x2b9   : > { %1315 = vrcp.f32 %v907_v26  ;;  %v934_v32 = vand.u32 2147483648, %v907_v26  ;;  %v932_v34 = vand.u32 2147483647, %v907_v26  ;;  %vm928_vm4 = vweird.f32 %v907_v26 }
 0x2bb   : > { %v935_v37 = vor.u32 1.1754944e-38, %v934_v32  ;;  %vm933_vm6 = vcmp.eq.f32.partialorder %v932_v34, 8.507059e+37 }
 0x2bd   : > { %v1314_v27 = vpop.eup %1313 }
 0x2be   : > { %v906_v28 = vadd.f32 1.0, %v1314_v27 }
 0x2bf   : > { %v1316_v29 = vpop.eup %1315 }
 0x2c0   : > { %v924_v30 = vmul.f32 %v1316_v29, %v907_v26  ;;  %1317 = vrcp.f32 %v906_v28  ;;  %vm929_vm3 = vweird.f32 %v1316_v29  ;;  %v919_v43 = vand.u32 2147483648, %v906_v28 }
 0x2c1   : > { %vm930_vm5 = vmor %vm928_vm4, %vm929_vm3  ;;  %v917_v45 = vand.u32 2147483647, %v906_v28  ;;  %vm913_vm8 = vweird.f32 %v906_v28 }
 0x2c2   : > { %v925_v31 = vsub.f32 1.0, %v924_v30  ;;  %v920_v49 = vor.u32 1.1754944e-38, %v919_v43 }
 0x2c3   : > { %vm918_vm10 = vcmp.eq.f32.partialorder %v917_v45, 8.507059e+37 }
 0x2c4   : > { %v926_v33 = vmul.f32 %v1316_v29, %v925_v31 }
 0x2c6   : > { %v1318_v35 = vpop.eup %1317  ;;  %v927_v36 = vadd.f32 %v1316_v29, %v926_v33 }
 0x2c7   : > { %v909_v38 = vmul.f32 %v1318_v35, %v906_v28  ;;  %vm914_vm7 = vweird.f32 %v1318_v35 }
 0x2c8   : > { %v931_v39 = vsel %vm930_vm5, %v1316_v29, %v927_v36  ;;  %vm915_vm9 = vmor %vm913_vm8, %vm914_vm7 }
 0x2c9   : > { %v936_v40 = vsel %vm933_vm6, %v935_v37, %v931_v39  ;;  %v910_v41 = vsub.f32 1.0, %v909_v38 }
 0x2ca   : > { %v941_v42 = vrot.slane %v936_v40, 1 }
 0x2cb   : > { %v911_v44 = vmul.f32 %v1318_v35, %v910_v41 }
 0x2cc   : > { %v945_v46 = vsub.f32 %v936_v40, %v941_v42 }
 0x2cd   : > { %v912_v47 = vadd.f32 %v1318_v35, %v911_v44 }
 0x2ce   : > { %v1153_v48 = vmul.f32 -50.0, %v945_v46 }
 0x2cf   : > { %v916_v50 = vsel %vm915_vm9, %v1318_v35, %v912_v47 }
 0x2d0   : > { %v952_v51 = vmul.f32 1.442695, %v1153_v48  ;;  %v921_v52 = vsel %vm918_vm10, %v920_v49, %v916_v50 }
 0x2d1   : > { %v940_v53 = vrot.slane %v921_v52, 1 }
 0x2d2   : > { %1319 = vpow2.f32 %v952_v51 }
 0x2d3   : > { %v944_v54 = vsub.f32 %v921_v52, %v940_v53 }
 0x2d5   : > { %v1152_v55 = vmul.f32 -50.0, %v944_v54 }
 0x2d7   : > { %v950_v56 = vmul.f32 1.442695, %v1152_v55 }
 0x2d8   : > { %v1320_v57 = vpop.eup %1319 }
 0x2d9   : > { %v955_v58 = vadd.f32 1.0, %v1320_v57  ;;  %1321 = vpow2.f32 %v950_v56 }
 0x2db   : > { %1323 = vrcp.f32 %v955_v58  ;;  %v982_v1 = vand.u32 2147483648, %v955_v58  ;;  %v980_v3 = vand.u32 2147483647, %v955_v58  ;;  %vm976_vm13 = vweird.f32 %v955_v58 }
 0x2dd   : > { %v983_v6 = vor.u32 1.1754944e-38, %v982_v1  ;;  %vm981_vm15 = vcmp.eq.f32.partialorder %v980_v3, 8.507059e+37 }
 0x2df   : > { %v1322_v59 = vpop.eup %1321 }
 0x2e0   : > { %v954_v60 = vadd.f32 1.0, %v1322_v59 }
 0x2e1   : > { %v1324_v61 = vpop.eup %1323 }
 0x2e2   : > { %v972_v63 = vmul.f32 %v1324_v61, %v955_v58  ;;  %1325 = vrcp.f32 %v954_v60  ;;  %vm977_vm12 = vweird.f32 %v1324_v61  ;;  %v967_v10 = vand.u32 2147483648, %v954_v60 }
 0x2e3   : > { %vm978_vm14 = vmor %vm976_vm13, %vm977_vm12  ;;  %v965_v11 = vand.u32 2147483647, %v954_v60  ;;  %vm961_vm2 = vweird.f32 %v954_v60 }
 0x2e4   : > { %v973_v0 = vsub.f32 1.0, %v972_v63  ;;  %v968_v13 = vor.u32 1.1754944e-38, %v967_v10 }
 0x2e5   : > { %vm966_vm4 = vcmp.eq.f32.partialorder %v965_v11, 8.507059e+37 }
 0x2e6   : > { %v974_v2 = vmul.f32 %v1324_v61, %v973_v0 }
 0x2e8   : > { %v1326_v4 = vpop.eup %1325  ;;  %v975_v5 = vadd.f32 %v1324_v61, %v974_v2 }
 0x2e9   : > { %v957_v7 = vmul.f32 %v1326_v4, %v954_v60  ;;  %vm962_vm0 = vweird.f32 %v1326_v4 }
 0x2ea   : > { %v979_v8 = vsel %vm978_vm14, %v1324_v61, %v975_v5  ;;  %vm963_vm3 = vmor %vm961_vm2, %vm962_vm0 }
 0x2eb   : > { %v984_v9 = vsel %vm981_vm15, %v983_v6, %v979_v8  ;;  %v958_v16 = vsub.f32 1.0, %v957_v7 }
 0x2ec   : > { %v989_v15 = vrot.slane %v984_v9, 6 }
 0x2ed   : > { %v959_v62 = vmul.f32 %v1326_v4, %v958_v16 }
 0x2ee   : > { %v994_v14 = vsel %vm992_vm1, %v936_v40, %v989_v15 }
 0x2ef   : > { %v960_v12 = vadd.f32 %v1326_v4, %v959_v62  ;;  %v997_v20 = vrot.slane %v994_v14, 4 }
 0x2f1   : > { %v964_v17 = vsel %vm963_vm3, %v1326_v4, %v960_v12 }
 0x2f2   : > { %v969_v18 = vsel %vm966_vm4, %v968_v13, %v964_v17 }
 0x2f3   : > { %v988_v19 = vrot.slane %v969_v18, 6 }
 0x2f5   : > { %v993_v21 = vsel %vm992_vm1, %v921_v52, %v988_v19 }
 0x2f6   : > { %v998_v22 = vsel %vm665_vm11, %v993_v21, %v997_v20 }
 0x2f7   : > { %1000 = vst [vmem:[%s420_s15] sm:$0x77] %v998_v22 }
 0x2f8 PF: > { %s17_s26 = sadd.s32 1, %s1349_s26   ;;  %s1597_s24 = smov %s1345_s25 }
 0x2f9   : > { %p14_p5 = scmp.ge.s32.totalorder %s17_s26, 4   ;;  %s1598_s25 = smov %s1600_s27 }
 0x2fb   :  { %16 = sbr.rel (!%p14_p5) target bundleno = 2 (0x2), region = 84 }

</bundles_post_ra>
